<compile_context>
chip_gen: v7x
topology: tpu7x:2x2x1
jax: 0.10.0
libtpu: 0.0.40
codegen_flags: <defaults>
</compile_context>

<pallas_src>
import functools

import jax
import jax.numpy as jnp
from jax import lax
from jax.experimental import pallas as pl
from jax.experimental.pallas import tpu as pltpu


def _round_up(n, m):
    return ((n + m - 1) // m) * m


def _pad_last2(a, rows, cols):
    pads = [(0, 0)] * (a.ndim - 2) + [(0, rows - a.shape[-2]),
                                      (0, cols - a.shape[-1])]
    return jnp.pad(a, pads)


def _cnf_kernel(x_ref, t_ref, w1x_ref, w1t_ref, b1_ref, w2_ref, b2_ref,
                w3_ref, b3_ref, o_ref, *, num_layers):
    """One batch tile through all CNF layers.

    torch.cat([x, t.unsqueeze(-1)], -1) @ W1 is rewritten (exactly) as
        x @ W1x  +  t * W1t
    where the second term is a (bm,1)*(1,H) VPU broadcast, avoiding a K=1
    MXU matmul and any in-kernel sublane slicing of the weight tile.
    """
    x = x_ref[...].astype(jnp.float32)          # (bm, dim_p)
    t = t_ref[...].astype(jnp.float32)          # (bm, 1)

    def layer(l, x):
        w1x = w1x_ref[l].astype(jnp.float32)    # (dim_p, H_p)
        w1t = w1t_ref[l].astype(jnp.float32)    # (1, H_p)
        b1 = b1_ref[l].astype(jnp.float32)      # (1, H_p)
        w2 = w2_ref[l].astype(jnp.float32)      # (H_p, H_p)
        b2 = b2_ref[l].astype(jnp.float32)      # (1, H_p)
        w3 = w3_ref[l].astype(jnp.float32)      # (H_p, dim_p)
        b3 = b3_ref[l].astype(jnp.float32)      # (1, dim_p)

        h = jnp.dot(x, w1x, preferred_element_type=jnp.float32)
        h = jnp.tanh(h + t * w1t + b1)          # time feature on the VPU
        h = jnp.tanh(jnp.dot(h, w2, preferred_element_type=jnp.float32) + b2)
        out = jnp.dot(h, w3, preferred_element_type=jnp.float32) + b3
        return x + out                          # residual

    if num_layers <= 4:
        # Small L: fully unroll (LLO scheduler sees everything, no loop overhead).
        for l in range(num_layers):
            x = layer(l, x)
    else:
        # Large L: bound live ranges to one layer's temporaries at a time.
        x = lax.fori_loop(0, num_layers, layer, x)

    o_ref[...] = x.astype(o_ref.dtype)


def prepare_params(params, dim):
    """Host-side layout plumbing: split W1 into x-part / t-part and zero-pad
    all feature dims to lane multiples (128)."""
    L, dim_p1, H = params["w1"].shape
    assert dim_p1 == dim + 1
    dim_p = _round_up(dim, 128)
    H_p = _round_up(H, 128)

    w1x = _pad_last2(params["w1"][:, :dim, :], dim_p, H_p)
    w1t = _pad_last2(params["w1"][:, dim:dim + 1, :], 1, H_p)
    b1 = _pad_last2(params["b1"], 1, H_p)
    w2 = _pad_last2(params["w2"], H_p, H_p)
    b2 = _pad_last2(params["b2"], 1, H_p)
    w3 = _pad_last2(params["w3"], H_p, dim_p)
    b3 = _pad_last2(params["b3"], 1, dim_p)
    return (w1x, w1t, b1, w2, b2, w3, b3), dim_p, H_p


def cnf_forward(x, t, params, *, block_batch=None):
    """params = dict with stacked 'w1','b1','w2','b2','w3','b3' (unpadded)."""
    B, dim = x.shape
    L = params["w1"].shape[0]

    (w1x, w1t, b1, w2, b2, w3, b3), dim_p, H_p = prepare_params(params, dim)

    # MXU-friendly batch tile: multiple of 8 sublanes, capped so that large
    # batches yield many grid tiles (pipelining; both TCs on v7x).
    if block_batch is None:
        block_batch = min(512, _round_up(B, 8))
    block_batch = max(8, _round_up(block_batch, 8))
    B_p = _round_up(B, block_batch)
    grid = (B_p // block_batch,)

    x_p = _pad_last2(x.astype(jnp.float32), B_p, dim_p)
    t_p = jnp.pad(t.reshape(B, 1).astype(jnp.float32), ((0, B_p - B), (0, 0)))

    # Explicit VMEM budget (resident weights + double-buffered I/O tiles +
    # activations), with headroom; capped well under v7x's 64 MiB physical VMEM.
    itemsize = 4
    weight_elems = (w1x.size + w1t.size + b1.size + w2.size + b2.size
                    + w3.size + b3.size)
    io_elems = block_batch * (2 * dim_p + 1)
    act_elems = 4 * block_batch * H_p
    vmem_est = itemsize * (2 * (weight_elems + io_elems) + act_elems)
    vmem_limit = int(min(max(2 * vmem_est, 16 << 20), 48 << 20))

    flops = 2 * B_p * L * (dim_p * H_p + H_p * H_p + H_p * dim_p)
    cost = pl.CostEstimate(
        flops=flops,
        transcendentals=2 * B_p * L * H_p,
        bytes_accessed=itemsize * (x_p.size + t_p.size + weight_elems
                                   + B_p * dim_p),
    )

    kernel = functools.partial(_cnf_kernel, num_layers=L)

    def whole(a):  # full-array (grid-constant) block for resident weights
        n = a.ndim
        return pl.BlockSpec(a.shape, lambda i, _n=n: (0,) * _n)

    out_p = pl.pallas_call(
        kernel,
        out_shape=jax.ShapeDtypeStruct((B_p, dim_p), x.dtype),
        grid_spec=pltpu.PrefetchScalarGridSpec(
            num_scalar_prefetch=0,
            grid=grid,
            in_specs=[
                pl.BlockSpec((block_batch, dim_p), lambda i: (i, 0)),   # x
                pl.BlockSpec((block_batch, 1), lambda i: (i, 0)),       # t
                whole(w1x), whole(w1t), whole(b1),                      # layer 1
                whole(w2), whole(b2),                                   # layer 2
                whole(w3), whole(b3),                                   # layer 3
            ],
            out_specs=pl.BlockSpec((block_batch, dim_p), lambda i: (i, 0)),
        ),
        compiler_params=pltpu.CompilerParams(
            dimension_semantics=("parallel",),
            vmem_limit_bytes=vmem_limit),
        cost_estimate=cost,
    )(x_p, t_p, w1x, w1t, b1, w2, b2, w3, b3)

    return out_p[:B, :dim]


def init_params(key, dim, hidden_dim, num_layers):
    """Deterministic init, mimicking nn.Linear's U(-1/sqrt(fan_in), +1/sqrt(fan_in))."""
    keys = jax.random.split(key, num_layers * 6)
    w1s, b1s, w2s, b2s, w3s, b3s = [], [], [], [], [], []

    def uni(k, shape, fan_in):
        bound = 1.0 / jnp.sqrt(fan_in)
        return jax.random.uniform(k, shape, jnp.float32, -bound, bound)

    for l in range(num_layers):
        k = keys[6 * l:6 * l + 6]
        w1s.append(uni(k[0], (dim + 1, hidden_dim), dim + 1))
        b1s.append(uni(k[1], (1, hidden_dim), dim + 1))
        w2s.append(uni(k[2], (hidden_dim, hidden_dim), hidden_dim))
        b2s.append(uni(k[3], (1, hidden_dim), hidden_dim))
        w3s.append(uni(k[4], (hidden_dim, dim), hidden_dim))
        b3s.append(uni(k[5], (1, dim), hidden_dim))

    return {
        "w1": jnp.stack(w1s), "b1": jnp.stack(b1s),
        "w2": jnp.stack(w2s), "b2": jnp.stack(b2s),
        "w3": jnp.stack(w3s), "b3": jnp.stack(b3s),
    }


def cnf_reference(x, t, params):
    """Pure-JAX reference matching the PyTorch forward exactly."""
    L = params["w1"].shape[0]
    t2 = t.reshape(-1, 1)
    with jax.default_matmul_precision("highest"):
        for l in range(L):
            inp = jnp.concatenate([x, t2], axis=-1)
            h = jnp.tanh(inp @ params["w1"][l] + params["b1"][l])
            h = jnp.tanh(h @ params["w2"][l] + params["b2"][l])
            x = x + (h @ params["w3"][l] + params["b3"][l])
    return x


if __name__ == "__main__":
    dim = 4
    hidden_dim = 32
    num_layers = 3
    batch = 8

    key = jax.random.PRNGKey(0)
    kx, kt, kp = jax.random.split(key, 3)

    x = jax.random.normal(kx, (batch, dim), jnp.float32)
    t = jax.random.uniform(kt, (batch,), jnp.float32)
    params = init_params(kp, dim, hidden_dim, num_layers)

    out = cnf_forward(x, t, params)
    out = jax.block_until_ready(out)

    ref = cnf_reference(x, t, params)
    assert out.shape == (batch, dim)
    assert jnp.allclose(out, ref, atol=1e-4, rtol=1e-4), (
        f"mismatch: max abs diff {jnp.max(jnp.abs(out - ref))}")

    print("KERNEL_OK")
</pallas_src>

<mosaic_0001>
module attributes {stable_mosaic.version = 11 : i64} {
  func.func @_cnf_kernel(%arg0: i32, %arg1: memref<8x128xf32, #tpu.memory_space<vmem>>, %arg2: memref<8x1xf32, #tpu.memory_space<vmem>>, %arg3: memref<3x128x128xf32, #tpu.memory_space<vmem>>, %arg4: memref<3x1x128xf32, #tpu.memory_space<vmem>>, %arg5: memref<3x1x128xf32, #tpu.memory_space<vmem>>, %arg6: memref<3x128x128xf32, #tpu.memory_space<vmem>>, %arg7: memref<3x1x128xf32, #tpu.memory_space<vmem>>, %arg8: memref<3x128x128xf32, #tpu.memory_space<vmem>>, %arg9: memref<3x1x128xf32, #tpu.memory_space<vmem>>, %arg10: memref<8x128xf32, #tpu.memory_space<vmem>>) attributes {dimension_semantics = [#tpu.dimension_semantics<parallel>], iteration_bounds = array<i64: 1>, scalar_prefetch = 0 : i64, scratch_operands = 0 : i64, tpu.core_type = #tpu.core_type<tc>, window_params = [{transform_indices = @transform_0, window_bounds = array<i64: 8, 128>}, {transform_indices = @transform_1, window_bounds = array<i64: 8, 1>}, {pipeline_mode = #tpu.pipeline_mode<synchronous>, transform_indices = @transform_2, window_bounds = array<i64: 3, 128, 128>}, {pipeline_mode = #tpu.pipeline_mode<synchronous>, transform_indices = @transform_3, window_bounds = array<i64: 3, 1, 128>}, {pipeline_mode = #tpu.pipeline_mode<synchronous>, transform_indices = @transform_4, window_bounds = array<i64: 3, 1, 128>}, {pipeline_mode = #tpu.pipeline_mode<synchronous>, transform_indices = @transform_5, window_bounds = array<i64: 3, 128, 128>}, {pipeline_mode = #tpu.pipeline_mode<synchronous>, transform_indices = @transform_6, window_bounds = array<i64: 3, 1, 128>}, {pipeline_mode = #tpu.pipeline_mode<synchronous>, transform_indices = @transform_7, window_bounds = array<i64: 3, 128, 128>}, {pipeline_mode = #tpu.pipeline_mode<synchronous>, transform_indices = @transform_8, window_bounds = array<i64: 3, 1, 128>}, {transform_indices = @transform_9, window_bounds = array<i64: 8, 128>}]} {
    %c0 = arith.constant 0 : index
    %c0_0 = arith.constant 0 : index
    %0 = vector.load %arg1[%c0, %c0_0] : memref<8x128xf32, #tpu.memory_space<vmem>>, vector<8x128xf32>
    %c0_1 = arith.constant 0 : index
    %c0_2 = arith.constant 0 : index
    %1 = vector.load %arg2[%c0_1, %c0_2] : memref<8x1xf32, #tpu.memory_space<vmem>>, vector<8x1xf32>
    %c0_3 = arith.constant 0 : index
    %c0_4 = arith.constant 0 : index
    %c0_5 = arith.constant 0 : index
    %2 = vector.load %arg3[%c0_3, %c0_4, %c0_5] : memref<3x128x128xf32, #tpu.memory_space<vmem>>, vector<1x128x128xf32>
    %3 = vector.shape_cast %2 : vector<1x128x128xf32> to vector<128x128xf32>
    %c0_6 = arith.constant 0 : index
    %c0_7 = arith.constant 0 : index
    %c0_8 = arith.constant 0 : index
    %4 = vector.load %arg4[%c0_6, %c0_7, %c0_8] : memref<3x1x128xf32, #tpu.memory_space<vmem>>, vector<1x1x128xf32>
    %5 = vector.shape_cast %4 : vector<1x1x128xf32> to vector<1x128xf32>
    %c0_9 = arith.constant 0 : index
    %c0_10 = arith.constant 0 : index
    %c0_11 = arith.constant 0 : index
    %6 = vector.load %arg5[%c0_9, %c0_10, %c0_11] : memref<3x1x128xf32, #tpu.memory_space<vmem>>, vector<1x1x128xf32>
    %7 = vector.shape_cast %6 : vector<1x1x128xf32> to vector<1x128xf32>
    %c0_12 = arith.constant 0 : index
    %c0_13 = arith.constant 0 : index
    %c0_14 = arith.constant 0 : index
    %8 = vector.load %arg6[%c0_12, %c0_13, %c0_14] : memref<3x128x128xf32, #tpu.memory_space<vmem>>, vector<1x128x128xf32>
    %9 = vector.shape_cast %8 : vector<1x128x128xf32> to vector<128x128xf32>
    %c0_15 = arith.constant 0 : index
    %c0_16 = arith.constant 0 : index
    %c0_17 = arith.constant 0 : index
    %10 = vector.load %arg7[%c0_15, %c0_16, %c0_17] : memref<3x1x128xf32, #tpu.memory_space<vmem>>, vector<1x1x128xf32>
    %11 = vector.shape_cast %10 : vector<1x1x128xf32> to vector<1x128xf32>
    %c0_18 = arith.constant 0 : index
    %c0_19 = arith.constant 0 : index
    %c0_20 = arith.constant 0 : index
    %12 = vector.load %arg8[%c0_18, %c0_19, %c0_20] : memref<3x128x128xf32, #tpu.memory_space<vmem>>, vector<1x128x128xf32>
    %13 = vector.shape_cast %12 : vector<1x128x128xf32> to vector<128x128xf32>
    %c0_21 = arith.constant 0 : index
    %c0_22 = arith.constant 0 : index
    %c0_23 = arith.constant 0 : index
    %14 = vector.load %arg9[%c0_21, %c0_22, %c0_23] : memref<3x1x128xf32, #tpu.memory_space<vmem>>, vector<1x1x128xf32>
    %15 = vector.shape_cast %14 : vector<1x1x128xf32> to vector<1x128xf32>
    %cst = arith.constant dense<0.000000e+00> : vector<8x128xf32>
    %16 = tpu.matmul %0, %3, %cst {dimension_numbers = #tpu.dot_dimension_numbers<[1], [0], [0], [1], [0, 0, 1, 1], [], []>} : vector<8x128xf32>, vector<128x128xf32>, vector<8x128xf32> -> vector<8x128xf32>
    %17 = vector.broadcast %1 : vector<8x1xf32> to vector<8x128xf32>
    %18 = vector.broadcast %5 : vector<1x128xf32> to vector<8x128xf32>
    %19 = arith.mulf %17, %18 : vector<8x128xf32>
    %20 = arith.addf %16, %19 : vector<8x128xf32>
    %21 = vector.broadcast %7 : vector<1x128xf32> to vector<8x128xf32>
    %22 = arith.addf %20, %21 : vector<8x128xf32>
    %23 = math.tanh %22 : vector<8x128xf32>
    %cst_24 = arith.constant dense<0.000000e+00> : vector<8x128xf32>
    %24 = tpu.matmul %23, %9, %cst_24 {dimension_numbers = #tpu.dot_dimension_numbers<[1], [0], [0], [1], [0, 0, 1, 1], [], []>} : vector<8x128xf32>, vector<128x128xf32>, vector<8x128xf32> -> vector<8x128xf32>
    %25 = vector.broadcast %11 : vector<1x128xf32> to vector<8x128xf32>
    %26 = arith.addf %24, %25 : vector<8x128xf32>
    %27 = math.tanh %26 : vector<8x128xf32>
    %cst_25 = arith.constant dense<0.000000e+00> : vector<8x128xf32>
    %28 = tpu.matmul %27, %13, %cst_25 {dimension_numbers = #tpu.dot_dimension_numbers<[1], [0], [0], [1], [0, 0, 1, 1], [], []>} : vector<8x128xf32>, vector<128x128xf32>, vector<8x128xf32> -> vector<8x128xf32>
    %29 = vector.broadcast %15 : vector<1x128xf32> to vector<8x128xf32>
    %30 = arith.addf %28, %29 : vector<8x128xf32>
    %31 = arith.addf %0, %30 : vector<8x128xf32>
    %c1 = arith.constant 1 : index
    %c0_26 = arith.constant 0 : index
    %c0_27 = arith.constant 0 : index
    %32 = vector.load %arg3[%c1, %c0_26, %c0_27] : memref<3x128x128xf32, #tpu.memory_space<vmem>>, vector<1x128x128xf32>
    %33 = vector.shape_cast %32 : vector<1x128x128xf32> to vector<128x128xf32>
    %c1_28 = arith.constant 1 : index
    %c0_29 = arith.constant 0 : index
    %c0_30 = arith.constant 0 : index
    %34 = vector.load %arg4[%c1_28, %c0_29, %c0_30] : memref<3x1x128xf32, #tpu.memory_space<vmem>>, vector<1x1x128xf32>
    %35 = vector.shape_cast %34 : vector<1x1x128xf32> to vector<1x128xf32>
    %c1_31 = arith.constant 1 : index
    %c0_32 = arith.constant 0 : index
    %c0_33 = arith.constant 0 : index
    %36 = vector.load %arg5[%c1_31, %c0_32, %c0_33] : memref<3x1x128xf32, #tpu.memory_space<vmem>>, vector<1x1x128xf32>
    %37 = vector.shape_cast %36 : vector<1x1x128xf32> to vector<1x128xf32>
    %c1_34 = arith.constant 1 : index
    %c0_35 = arith.constant 0 : index
    %c0_36 = arith.constant 0 : index
    %38 = vector.load %arg6[%c1_34, %c0_35, %c0_36] : memref<3x128x128xf32, #tpu.memory_space<vmem>>, vector<1x128x128xf32>
    %39 = vector.shape_cast %38 : vector<1x128x128xf32> to vector<128x128xf32>
    %c1_37 = arith.constant 1 : index
    %c0_38 = arith.constant 0 : index
    %c0_39 = arith.constant 0 : index
    %40 = vector.load %arg7[%c1_37, %c0_38, %c0_39] : memref<3x1x128xf32, #tpu.memory_space<vmem>>, vector<1x1x128xf32>
    %41 = vector.shape_cast %40 : vector<1x1x128xf32> to vector<1x128xf32>
    %c1_40 = arith.constant 1 : index
    %c0_41 = arith.constant 0 : index
    %c0_42 = arith.constant 0 : index
    %42 = vector.load %arg8[%c1_40, %c0_41, %c0_42] : memref<3x128x128xf32, #tpu.memory_space<vmem>>, vector<1x128x128xf32>
    %43 = vector.shape_cast %42 : vector<1x128x128xf32> to vector<128x128xf32>
    %c1_43 = arith.constant 1 : index
    %c0_44 = arith.constant 0 : index
    %c0_45 = arith.constant 0 : index
    %44 = vector.load %arg9[%c1_43, %c0_44, %c0_45] : memref<3x1x128xf32, #tpu.memory_space<vmem>>, vector<1x1x128xf32>
    %45 = vector.shape_cast %44 : vector<1x1x128xf32> to vector<1x128xf32>
    %cst_46 = arith.constant dense<0.000000e+00> : vector<8x128xf32>
    %46 = tpu.matmul %31, %33, %cst_46 {dimension_numbers = #tpu.dot_dimension_numbers<[1], [0], [0], [1], [0, 0, 1, 1], [], []>} : vector<8x128xf32>, vector<128x128xf32>, vector<8x128xf32> -> vector<8x128xf32>
    %47 = vector.broadcast %1 : vector<8x1xf32> to vector<8x128xf32>
    %48 = vector.broadcast %35 : vector<1x128xf32> to vector<8x128xf32>
    %49 = arith.mulf %47, %48 : vector<8x128xf32>
    %50 = arith.addf %46, %49 : vector<8x128xf32>
    %51 = vector.broadcast %37 : vector<1x128xf32> to vector<8x128xf32>
    %52 = arith.addf %50, %51 : vector<8x128xf32>
    %53 = math.tanh %52 : vector<8x128xf32>
    %cst_47 = arith.constant dense<0.000000e+00> : vector<8x128xf32>
    %54 = tpu.matmul %53, %39, %cst_47 {dimension_numbers = #tpu.dot_dimension_numbers<[1], [0], [0], [1], [0, 0, 1, 1], [], []>} : vector<8x128xf32>, vector<128x128xf32>, vector<8x128xf32> -> vector<8x128xf32>
    %55 = vector.broadcast %41 : vector<1x128xf32> to vector<8x128xf32>
    %56 = arith.addf %54, %55 : vector<8x128xf32>
    %57 = math.tanh %56 : vector<8x128xf32>
    %cst_48 = arith.constant dense<0.000000e+00> : vector<8x128xf32>
    %58 = tpu.matmul %57, %43, %cst_48 {dimension_numbers = #tpu.dot_dimension_numbers<[1], [0], [0], [1], [0, 0, 1, 1], [], []>} : vector<8x128xf32>, vector<128x128xf32>, vector<8x128xf32> -> vector<8x128xf32>
    %59 = vector.broadcast %45 : vector<1x128xf32> to vector<8x128xf32>
    %60 = arith.addf %58, %59 : vector<8x128xf32>
    %61 = arith.addf %31, %60 : vector<8x128xf32>
    %c2 = arith.constant 2 : index
    %c0_49 = arith.constant 0 : index
    %c0_50 = arith.constant 0 : index
    %62 = vector.load %arg3[%c2, %c0_49, %c0_50] : memref<3x128x128xf32, #tpu.memory_space<vmem>>, vector<1x128x128xf32>
    %63 = vector.shape_cast %62 : vector<1x128x128xf32> to vector<128x128xf32>
    %c2_51 = arith.constant 2 : index
    %c0_52 = arith.constant 0 : index
    %c0_53 = arith.constant 0 : index
    %64 = vector.load %arg4[%c2_51, %c0_52, %c0_53] : memref<3x1x128xf32, #tpu.memory_space<vmem>>, vector<1x1x128xf32>
    %65 = vector.shape_cast %64 : vector<1x1x128xf32> to vector<1x128xf32>
    %c2_54 = arith.constant 2 : index
    %c0_55 = arith.constant 0 : index
    %c0_56 = arith.constant 0 : index
    %66 = vector.load %arg5[%c2_54, %c0_55, %c0_56] : memref<3x1x128xf32, #tpu.memory_space<vmem>>, vector<1x1x128xf32>
    %67 = vector.shape_cast %66 : vector<1x1x128xf32> to vector<1x128xf32>
    %c2_57 = arith.constant 2 : index
    %c0_58 = arith.constant 0 : index
    %c0_59 = arith.constant 0 : index
    %68 = vector.load %arg6[%c2_57, %c0_58, %c0_59] : memref<3x128x128xf32, #tpu.memory_space<vmem>>, vector<1x128x128xf32>
    %69 = vector.shape_cast %68 : vector<1x128x128xf32> to vector<128x128xf32>
    %c2_60 = arith.constant 2 : index
    %c0_61 = arith.constant 0 : index
    %c0_62 = arith.constant 0 : index
    %70 = vector.load %arg7[%c2_60, %c0_61, %c0_62] : memref<3x1x128xf32, #tpu.memory_space<vmem>>, vector<1x1x128xf32>
    %71 = vector.shape_cast %70 : vector<1x1x128xf32> to vector<1x128xf32>
    %c2_63 = arith.constant 2 : index
    %c0_64 = arith.constant 0 : index
    %c0_65 = arith.constant 0 : index
    %72 = vector.load %arg8[%c2_63, %c0_64, %c0_65] : memref<3x128x128xf32, #tpu.memory_space<vmem>>, vector<1x128x128xf32>
    %73 = vector.shape_cast %72 : vector<1x128x128xf32> to vector<128x128xf32>
    %c2_66 = arith.constant 2 : index
    %c0_67 = arith.constant 0 : index
    %c0_68 = arith.constant 0 : index
    %74 = vector.load %arg9[%c2_66, %c0_67, %c0_68] : memref<3x1x128xf32, #tpu.memory_space<vmem>>, vector<1x1x128xf32>
    %75 = vector.shape_cast %74 : vector<1x1x128xf32> to vector<1x128xf32>
    %cst_69 = arith.constant dense<0.000000e+00> : vector<8x128xf32>
    %76 = tpu.matmul %61, %63, %cst_69 {dimension_numbers = #tpu.dot_dimension_numbers<[1], [0], [0], [1], [0, 0, 1, 1], [], []>} : vector<8x128xf32>, vector<128x128xf32>, vector<8x128xf32> -> vector<8x128xf32>
    %77 = vector.broadcast %1 : vector<8x1xf32> to vector<8x128xf32>
    %78 = vector.broadcast %65 : vector<1x128xf32> to vector<8x128xf32>
    %79 = arith.mulf %77, %78 : vector<8x128xf32>
    %80 = arith.addf %76, %79 : vector<8x128xf32>
    %81 = vector.broadcast %67 : vector<1x128xf32> to vector<8x128xf32>
    %82 = arith.addf %80, %81 : vector<8x128xf32>
    %83 = math.tanh %82 : vector<8x128xf32>
    %cst_70 = arith.constant dense<0.000000e+00> : vector<8x128xf32>
    %84 = tpu.matmul %83, %69, %cst_70 {dimension_numbers = #tpu.dot_dimension_numbers<[1], [0], [0], [1], [0, 0, 1, 1], [], []>} : vector<8x128xf32>, vector<128x128xf32>, vector<8x128xf32> -> vector<8x128xf32>
    %85 = vector.broadcast %71 : vector<1x128xf32> to vector<8x128xf32>
    %86 = arith.addf %84, %85 : vector<8x128xf32>
    %87 = math.tanh %86 : vector<8x128xf32>
    %cst_71 = arith.constant dense<0.000000e+00> : vector<8x128xf32>
    %88 = tpu.matmul %87, %73, %cst_71 {dimension_numbers = #tpu.dot_dimension_numbers<[1], [0], [0], [1], [0, 0, 1, 1], [], []>} : vector<8x128xf32>, vector<128x128xf32>, vector<8x128xf32> -> vector<8x128xf32>
    %89 = vector.broadcast %75 : vector<1x128xf32> to vector<8x128xf32>
    %90 = arith.addf %88, %89 : vector<8x128xf32>
    %91 = arith.addf %61, %90 : vector<8x128xf32>
    %c0_72 = arith.constant 0 : index
    %c0_73 = arith.constant 0 : index
    %92 = vector.load %arg10[%c0_72, %c0_73] : memref<8x128xf32, #tpu.memory_space<vmem>>, vector<8x128xf32>
    tpu.vector_store %arg10[%c0_72, %c0_73], %91 {strides = array<i32>} : memref<8x128xf32, #tpu.memory_space<vmem>>, vector<8x128xf32>,
    return
  }
  func.func @transform_0(%arg0: i32) -> (i32, i32) {
    %c0_i32 = arith.constant 0 : i32
    %c0_i32_0 = arith.constant 0 : i32
    return %arg0, %c0_i32 : i32, i32
  }
  func.func @transform_1(%arg0: i32) -> (i32, i32) {
    %c0_i32 = arith.constant 0 : i32
    %c0_i32_0 = arith.constant 0 : i32
    return %arg0, %c0_i32 : i32, i32
  }
  func.func @transform_2(%arg0: i32) -> (i32, i32, i32) {
    %c0_i32 = arith.constant 0 : i32
    %c0_i32_0 = arith.constant 0 : i32
    %c0_i32_1 = arith.constant 0 : i32
    %c0_i32_2 = arith.constant 0 : i32
    return %c0_i32, %c0_i32_0, %c0_i32_1 : i32, i32, i32
  }
  func.func @transform_3(%arg0: i32) -> (i32, i32, i32) {
    %c0_i32 = arith.constant 0 : i32
    %c0_i32_0 = arith.constant 0 : i32
    %c0_i32_1 = arith.constant 0 : i32
    %c0_i32_2 = arith.constant 0 : i32
    return %c0_i32, %c0_i32_0, %c0_i32_1 : i32, i32, i32
  }
  func.func @transform_4(%arg0: i32) -> (i32, i32, i32) {
    %c0_i32 = arith.constant 0 : i32
    %c0_i32_0 = arith.constant 0 : i32
    %c0_i32_1 = arith.constant 0 : i32
    %c0_i32_2 = arith.constant 0 : i32
    return %c0_i32, %c0_i32_0, %c0_i32_1 : i32, i32, i32
  }
  func.func @transform_5(%arg0: i32) -> (i32, i32, i32) {
    %c0_i32 = arith.constant 0 : i32
    %c0_i32_0 = arith.constant 0 : i32
    %c0_i32_1 = arith.constant 0 : i32
    %c0_i32_2 = arith.constant 0 : i32
    return %c0_i32, %c0_i32_0, %c0_i32_1 : i32, i32, i32
  }
  func.func @transform_6(%arg0: i32) -> (i32, i32, i32) {
    %c0_i32 = arith.constant 0 : i32
    %c0_i32_0 = arith.constant 0 : i32
    %c0_i32_1 = arith.constant 0 : i32
    %c0_i32_2 = arith.constant 0 : i32
    return %c0_i32, %c0_i32_0, %c0_i32_1 : i32, i32, i32
  }
  func.func @transform_7(%arg0: i32) -> (i32, i32, i32) {
    %c0_i32 = arith.constant 0 : i32
    %c0_i32_0 = arith.constant 0 : i32
    %c0_i32_1 = arith.constant 0 : i32
    %c0_i32_2 = arith.constant 0 : i32
    return %c0_i32, %c0_i32_0, %c0_i32_1 : i32, i32, i32
  }
  func.func @transform_8(%arg0: i32) -> (i32, i32, i32) {
    %c0_i32 = arith.constant 0 : i32
    %c0_i32_0 = arith.constant 0 : i32
    %c0_i32_1 = arith.constant 0 : i32
    %c0_i32_2 = arith.constant 0 : i32
    return %c0_i32, %c0_i32_0, %c0_i32_1 : i32, i32, i32
  }
  func.func @transform_9(%arg0: i32) -> (i32, i32) {
    %c0_i32 = arith.constant 0 : i32
    %c0_i32_0 = arith.constant 0 : i32
    return %arg0, %c0_i32 : i32, i32
  }
}

</mosaic_0001>

<bundles_post_ra>
// kernel: tpu_custom_call.1
= control target key start
LH: loop header
LB: loop body
LE: loop exit
PB: predicated region body
PF: predicated region fallthrough
CT: control target
= control target key end

     0   :  { %14 = vsyncpa [#allocation3], 0  ;;  %s2079_s0 = inlined_call_operand.vmem [shape: f32[8,128], index: 0, kind: input, shape index: {}]   ;;  %s2080_s1 = inlined_call_operand.vmem [shape: f32[8,1], index: 1, kind: input, shape index: {}]   ;;  %s2081_s2 = inlined_call_operand.hbm [shape: f32[3,128,128], index: 2, kind: input, shape index: {}]   ;;  %s2082_s3 = inlined_call_operand.vmem [shape: f32[3,1,128], index: 3, kind: input, shape index: {}]   ;;  %s2083_s4 = inlined_call_operand.vmem [shape: f32[3,1,128], index: 4, kind: input, shape index: {}]   ;;  %s2084_s5 = inlined_call_operand.hbm [shape: f32[3,128,128], index: 5, kind: input, shape index: {}]   ;;  %s2085_s6 = inlined_call_operand.vmem [shape: f32[3,1,128], index: 6, kind: input, shape index: {}]   ;;  %s2086_s7 = inlined_call_operand.hbm [shape: f32[3,128,128], index: 7, kind: input, shape index: {}]   ;;  %s2087_s8 = inlined_call_operand.vmem [shape: f32[3,1,128], index: 8, kind: input, shape index: {}]   ;;  %s2088_s9 = inlined_call_operand.hbm [shape: f32[8,128], index: 9, kind: output, shape index: {}]  }
   0x1   :  { %15 = vsyncpa [#allocation6], 0 }
   0x2   :  { %16 = vsyncpa [#allocation4], 0  ;;  %s1806_s30 = smov [#allocation5]   ;;  %s1807_s11 = smov [#allocation2]  }
   0x3   :  { %s42_s10 = sshll.u32 %s1806_s30, 4  ;;  %s26_s12 = sshll.u32 %s1807_s11, 4  ;;  %s43_s10 = int_to_ptr.vmem [resolvable:$true] %s42_s10  ;;  %s1866_s12 = int_to_ptr.vmem [resolvable:$true] %s26_s12 }
   0x4   :  { %s1712_s15 = scalar_lea.hbm %s2084_s5, 6144 }
   0x5   :  { %p1713_p0 = scmp.ne.s32.totalorder %s2084_s5, %s1712_s15  ;;  %p1716_p1 = scmp.lt.u32.totalorder %s1712_s15, %s2084_s5 }
   0x7   :  { %p1718_p2 = pnand %p1716_p1, %p1713_p0 }
   0x9   :  { %1721 = shalt.err (!%p1718_p2)
}
   0xa   :  { %s1722_s20 = scalar_lea.vmem %s43_s10, 6144  ;;  %p1727_p4 = scmp.lt.s32.totalorder %s43_s10, %s43_s10 }
   0xb   :  { %p1723_p3 = scmp.ne.s32.totalorder %s43_s10, %s1722_s20  ;;  %p1728_p5 = scmp.lt.s32.totalorder %s1722_s20, %s1722_s20 }
   0xd   :  { %p1729_p6 = por %p1728_p5, %p1727_p4 }
   0xf   :  { %p1730_p7 = pnand %p1729_p6, %p1723_p3 }
  0x11   :  { %1733 = shalt.err (!%p1730_p7)
}
  0x12   :  { %s1808_s21 = smov 128   ;;  %s1809_s22 = smov 8  }
  0x13   :  { %48 = dma.hbm_to_vmem [thread:$0]  %s2084_s5, 6144, %s43_s10, [#allocation6], %s1808_s21, %s1808_s21, %s1809_s22  }
  0x14   :  { %s1734_s27 = scalar_lea.hbm %s2081_s2, 6144 }
  0x15   :  { %p1735_p8 = scmp.ne.s32.totalorder %s2081_s2, %s1734_s27  ;;  %p1738_p9 = scmp.lt.u32.totalorder %s1734_s27, %s2081_s2 }
  0x17   :  { %p1740_p10 = pnand %p1738_p9, %p1735_p8 }
  0x19   :  { %1743 = shalt.err (!%p1740_p10)
}
  0x1a   :  { %s1744_s13 = scalar_lea.vmem %s1866_s12, 6144  ;;  %p1749_p12 = scmp.lt.s32.totalorder %s1866_s12, %s1866_s12 }
  0x1b   :  { %p1745_p11 = scmp.ne.s32.totalorder %s1866_s12, %s1744_s13  ;;  %p1750_p13 = scmp.lt.s32.totalorder %s1744_s13, %s1744_s13 }
  0x1d   :  { %p1751_p0 = por %p1750_p13, %p1749_p12 }
  0x1f   :  { %p1752_p1 = pnand %p1751_p0, %p1745_p11 }
  0x21   :  { %1755 = shalt.err (!%p1752_p1)
}
  0x22   :  { %32 = dma.hbm_to_vmem [thread:$0]  %s2081_s2, 6144, %s1866_s12, [#allocation3], %s1808_s21, %s1808_s21, %s1809_s22  }
  0x23   :  { %s1810_s14 = smov [#allocation7]   ;;  %s1756_s18 = scalar_lea.hbm %s2086_s7, 6144 }
  0x24   :  { %s56_s15 = sshll.u32 %s1810_s14, 4  ;;  %p1757_p2 = scmp.ne.s32.totalorder %s2086_s7, %s1756_s18  ;;  %s57_s15 = int_to_ptr.vmem [resolvable:$true] %s56_s15 }
  0x25   :  { %p1760_p3 = scmp.lt.u32.totalorder %s1756_s18, %s2086_s7 }
  0x27   :  { %p1762_p4 = pnand %p1760_p3, %p1757_p2 }
  0x29   :  { %1765 = shalt.err (!%p1762_p4)
}
  0x2a   :  { %s1766_s25 = scalar_lea.vmem %s57_s15, 6144  ;;  %p1771_p6 = scmp.lt.s32.totalorder %s57_s15, %s57_s15 }
  0x2b   :  { %p1767_p5 = scmp.ne.s32.totalorder %s57_s15, %s1766_s25  ;;  %p1772_p7 = scmp.lt.s32.totalorder %s1766_s25, %s1766_s25 }
  0x2d   :  { %p1773_p8 = por %p1772_p7, %p1771_p6 }
  0x2f   :  { %p1774_p9 = pnand %p1773_p8, %p1767_p5 }
  0x31   :  { %1777 = shalt.err (!%p1774_p9)
}
  0x32   :  { %62 = dma.hbm_to_vmem [thread:$0]  %s2086_s7, 6144, %s57_s15, [#allocation6], %s1808_s21, %s1808_s21, %s1809_s22  }
  0x33   :  { %1800 = dma.done.wait [#allocation3], 6144  }
  0x34   :  { %1801 = vsyncadd [#allocation3], 4294961152 }
  0x35   :  { %1802 = dma.done.wait [#allocation6], 12288  }
  0x36   :  { %1803 = vsyncadd [#allocation6], 4294955008  ;;  %v1811_v0 = vmov 0.0|0.0   ;;  %vm1812_vm0 = vmmov 0   ;;  %v1813_v1 = vmov 0.0   ;;  %v1814_v2 = vmov 0  }
  0x37   :  { %1473 = vmatprep.subr.bf16.mxu0 %v1811_v0  ;;  %1190 = vmatprep.mubr.msk.f32.mxu0 %vm1812_vm0, %v1813_v1  ;;  %v76_v3 = vld [vmem:[#allocation2] sm:$0xff]  ;;  %v77_v4 = vld [vmem:[#allocation2 + $0x8] sm:$0xff]  ;;  %v78_v5 = vld [vmem:[#allocation2 + $0x10] sm:$0xff]  ;;  %s1815_s7 = smov [#allocation8]  }
  0x38   :  { %1699 = vset.pattern.permute.xlu0 %v1814_v2  ;;  %1497 = vmatprep.subr.bf16.mxu1 %v1811_v0  ;;  %v1474_v6 = vpack.c.bf16 %v77_v4, %v76_v3  ;;  %v79_v7 = vld [vmem:[#allocation2 + $0x18] sm:$0xff]  ;;  %v80_v9 = vld [vmem:[#allocation2 + $0x20] sm:$0xff]  ;;  %v81_v10 = vld [vmem:[#allocation2 + $0x28] sm:$0xff]  ;;  %s975_s21 = sshll.u32 %s1815_s7, 4  ;;  %s976_s21 = int_to_ptr.vmem [resolvable:$true] %s975_s21 }
  0x39   :  { %1225 = vmatprep.mubr.msk.f32.mxu1 %vm1812_vm0, %v1813_v1  ;;  %v1477_v8 = vpack.c.bf16 %v79_v7, %v78_v5  ;;  %v75_v11 = vld [vmem:[%s2080_s1] sm:$0xff]  ;;  %v95_v13 = vld [vmem:[#allocation5 + $0x8] sm:$0xff]  ;;  %v96_v14 = vld [vmem:[#allocation5 + $0x10] sm:$0xff]  ;;  %v1480_v15 = vpack.c.bf16 %v81_v10, %v80_v9  ;;  %p1783_p11 = scmp.lt.s32.totalorder %s976_s21, %s976_s21 }
  0x3a   :  { %1475 = vmatpush3.bf16.msra.mxu0 %v1474_v6  ;;  %130 = vperm.xlu0 %1699, %v75_v11   ;;  %v94_v12 = vld [vmem:[#allocation5] sm:$0xff]  ;;  %v97_v17 = vld [vmem:[#allocation5 + $0x18] sm:$0xff]  ;;  %v82_v18 = vld [vmem:[#allocation2 + $0x30] sm:$0xff] }
  0x3b   :  { %1476 = vmatprep.subr.bf16.mxu0 %v1811_v0  ;;  %v1498_v16 = vpack.c.bf16 %v95_v13, %v94_v12  ;;  %v83_v19 = vld [vmem:[#allocation2 + $0x38] sm:$0xff]  ;;  %v1501_v20 = vpack.c.bf16 %v97_v17, %v96_v14  ;;  %v98_v21 = vld [vmem:[#allocation5 + $0x20] sm:$0xff]  ;;  %v99_v22 = vld [vmem:[#allocation5 + $0x28] sm:$0xff] }
  0x3c   :  { %v1483_v23 = vpack.c.bf16 %v83_v19, %v82_v18  ;;  %v84_v24 = vld [vmem:[#allocation2 + $0x40] sm:$0xff]  ;;  %v85_v25 = vld [vmem:[#allocation2 + $0x48] sm:$0xff]  ;;  %v1504_v26 = vpack.c.bf16 %v99_v22, %v98_v21  ;;  %v100_v27 = vld [vmem:[#allocation5 + $0x30] sm:$0xff] }
  0x3d   :  { %1499 = vmatpush3.bf16.msra.mxu1 %v1498_v16  ;;  %v101_v28 = vld [vmem:[#allocation5 + $0x38] sm:$0xff]  ;;  %v1486_v29 = vpack.c.bf16 %v85_v25, %v84_v24  ;;  %v86_v30 = vld [vmem:[#allocation2 + $0x50] sm:$0xff]  ;;  %v88_v34 = vld [vmem:[#allocation2 + $0x60] sm:$0xff] }
  0x3e   :  { %1478 = vmatpush3.bf16.msra.mxu0 %v1477_v8  ;;  %1500 = vmatprep.subr.bf16.mxu1 %v1811_v0  ;;  %v87_v31 = vld [vmem:[#allocation2 + $0x58] sm:$0xff]  ;;  %v1507_v32 = vpack.c.bf16 %v101_v28, %v100_v27  ;;  %v89_v35 = vld [vmem:[#allocation2 + $0x68] sm:$0xff]  ;;  %v90_v37 = vld [vmem:[#allocation2 + $0x70] sm:$0xff] }
  0x3f   :  { %1479 = vmatprep.subr.bf16.mxu0 %v1811_v0  ;;  %v1489_v33 = vpack.c.bf16 %v87_v31, %v86_v30  ;;  %v1492_v36 = vpack.c.bf16 %v89_v35, %v88_v34  ;;  %v91_v38 = vld [vmem:[#allocation2 + $0x78] sm:$0xff]  ;;  %v1941_v40 = vld [vmem:[%s2079_s0] sm:$0xff]  ;;  %v103_v42 = vld [vmem:[#allocation5 + $0x48] sm:$0xff] }
  0x40   :  { %v1495_v39 = vpack.c.bf16 %v91_v38, %v90_v37  ;;  %v102_v41 = vld [vmem:[#allocation5 + $0x40] sm:$0xff]  ;;  %v104_v44 = vld [vmem:[#allocation5 + $0x50] sm:$0xff]  ;;  %v105_v45 = vld [vmem:[#allocation5 + $0x58] sm:$0xff] }
  0x41   :  { %1502 = vmatpush3.bf16.msra.mxu1 %v1501_v20  ;;  %v1510_v43 = vpack.c.bf16 %v103_v42, %v102_v41  ;;  %v1513_v46 = vpack.c.bf16 %v105_v45, %v104_v44  ;;  %v106_v47 = vld [vmem:[#allocation5 + $0x60] sm:$0xff]  ;;  %v107_v48 = vld [vmem:[#allocation5 + $0x68] sm:$0xff]  ;;  %v108_v50 = vld [vmem:[#allocation5 + $0x70] sm:$0xff] }
  0x42   :  { %1481 = vmatpush3.bf16.msra.mxu0 %v1480_v15  ;;  %1503 = vmatprep.subr.bf16.mxu1 %v1811_v0  ;;  %v1516_v49 = vpack.c.bf16 %v107_v48, %v106_v47  ;;  %v109_v51 = vld [vmem:[#allocation5 + $0x78] sm:$0xff]  ;;  %v111_v53 = vld [vmem:[#allocation7] sm:$0xff]  ;;  %v112_v54 = vld [vmem:[#allocation7 + $0x8] sm:$0xff] }
  0x43   :  { %1482 = vmatprep.subr.bf16.mxu0 %v1811_v0  ;;  %v1519_v52 = vpack.c.bf16 %v109_v51, %v108_v50  ;;  %v113_v55 = vld [vmem:[#allocation7 + $0x10] sm:$0xff]  ;;  %v1522_v56 = vpack.c.bf16 %v112_v54, %v111_v53  ;;  %v114_v57 = vld [vmem:[#allocation7 + $0x18] sm:$0xff]  ;;  %v115_v59 = vld [vmem:[#allocation7 + $0x20] sm:$0xff] }
  0x44   :  { %v1525_v58 = vpack.c.bf16 %v114_v57, %v113_v55  ;;  %v116_v60 = vld [vmem:[#allocation7 + $0x28] sm:$0xff]  ;;  %v117_v62 = vld [vmem:[#allocation7 + $0x30] sm:$0xff]  ;;  %v118_v63 = vld [vmem:[#allocation7 + $0x38] sm:$0xff] }
  0x45   :  { %1505 = vmatpush3.bf16.msra.mxu1 %v1504_v26  ;;  %v1528_v61 = vpack.c.bf16 %v116_v60, %v115_v59  ;;  %v1531_v2 = vpack.c.bf16 %v118_v63, %v117_v62  ;;  %v119_v3 = vld [vmem:[#allocation7 + $0x40] sm:$0xff]  ;;  %v120_v4 = vld [vmem:[#allocation7 + $0x48] sm:$0xff]  ;;  %v121_v15 = vld [vmem:[#allocation7 + $0x50] sm:$0xff] }
  0x46   :  { %1484 = vmatpush3.bf16.msra.mxu0 %v1483_v23  ;;  %1506 = vmatprep.subr.bf16.mxu1 %v1811_v0  ;;  %v1534_v5 = vpack.c.bf16 %v120_v4, %v119_v3  ;;  %v985_v6 = vld [vmem:[%s2082_s3] ss:$0 sm:$0xff]  ;;  %v122_v16 = vld [vmem:[#allocation7 + $0x58] sm:$0xff]  ;;  %v124_v19 = vld [vmem:[#allocation7 + $0x68] sm:$0xff] }
  0x47   :  { %1485 = vmatprep.subr.bf16.mxu0 %v1811_v0  ;;  %v986_v9 = vld [vmem:[%s2083_s4] ss:$0 sm:$0xff]  ;;  %v1537_v17 = vpack.c.bf16 %v122_v16, %v121_v15  ;;  %v125_v21 = vld [vmem:[#allocation7 + $0x70] sm:$0xff]  ;;  %v126_v22 = vld [vmem:[#allocation7 + $0x78] sm:$0xff] }
  0x48   :  { %v123_v18 = vld [vmem:[#allocation7 + $0x60] sm:$0xff]  ;;  %v1543_v23 = vpack.c.bf16 %v126_v22, %v125_v21  ;;  %v374_v25 = vld [vmem:[#allocation2 + $0x88] sm:$0xff]  ;;  %v375_v26 = vld [vmem:[#allocation2 + $0x90] sm:$0xff] }
  0x49   :  { %1508 = vmatpush3.bf16.msra.mxu1 %v1507_v32  ;;  %v1540_v20 = vpack.c.bf16 %v124_v19, %v123_v18  ;;  %v373_v24 = vld [vmem:[#allocation2 + $0x80] sm:$0xff]  ;;  %v376_v28 = vld [vmem:[#allocation2 + $0x98] sm:$0xff]  ;;  %v378_v31 = vld [vmem:[#allocation2 + $0xa8] sm:$0xff] }
  0x4a   :  { %1487 = vmatpush3.bf16.msra.mxu0 %v1486_v29  ;;  %1509 = vmatprep.subr.bf16.mxu1 %v1811_v0  ;;  %v1546_v27 = vpack.c.bf16 %v374_v25, %v373_v24  ;;  %v1549_v29 = vpack.c.bf16 %v376_v28, %v375_v26  ;;  %v377_v30 = vld [vmem:[#allocation2 + $0xa0] sm:$0xff]  ;;  %v380_v34 = vld [vmem:[#allocation2 + $0xb8] sm:$0xff]  ;;  %v382_v37 = vld [vmem:[#allocation2 + $0xc8] sm:$0xff] }
  0x4b   :  { %1488 = vmatprep.subr.bf16.mxu0 %v1811_v0  ;;  %v1552_v32 = vpack.c.bf16 %v378_v31, %v377_v30  ;;  %v384_v41 = vld [vmem:[#allocation2 + $0xd8] sm:$0xff]  ;;  %v386_v44 = vld [vmem:[#allocation2 + $0xe8] sm:$0xff]  ;;  %v387_v51 = vld [vmem:[#allocation2 + $0xf0] sm:$0xff] }
  0x4c   :  { %v394_v54 = vld [vmem:[#allocation5 + $0x80] sm:$0xff]  ;;  %v395_v55 = vld [vmem:[#allocation5 + $0x88] sm:$0xff]  ;;  %v400_v63 = vld [vmem:[#allocation5 + $0xb0] sm:$0xff] }
  0x4d   :  { %1511 = vmatpush3.bf16.msra.mxu1 %v1510_v43  ;;  %v385_v43 = vld [vmem:[#allocation2 + $0xe0] sm:$0xff]  ;;  %v1570_v57 = vpack.c.bf16 %v395_v55, %v394_v54  ;;  %v408_v18 = vld [vmem:[#allocation5 + $0xf0] sm:$0xff]  ;;  %v409_v19 = vld [vmem:[#allocation5 + $0xf8] sm:$0xff] }
  0x4e   :  { %1490 = vmatpush3.bf16.msra.mxu0 %v1489_v33  ;;  %1512 = vmatprep.subr.bf16.mxu1 %v1811_v0  ;;  %v379_v33 = vld [vmem:[#allocation2 + $0xb0] sm:$0xff]  ;;  %v1564_v45 = vpack.c.bf16 %v386_v44, %v385_v43  ;;  %v398_v60 = vld [vmem:[#allocation5 + $0xa0] sm:$0xff]  ;;  %v414_v22 = vld [vmem:[#allocation7 + $0x88] sm:$0xff] }
  0x4f   :  { %1491 = vmatprep.subr.bf16.mxu0 %v1811_v0  ;;  %v1555_v35 = vpack.c.bf16 %v380_v34, %v379_v33  ;;  %v988_v4 = vld [vmem:[%s2087_s8] ss:$0 sm:$0xff]  ;;  %v416_v25 = vld [vmem:[#allocation7 + $0x98] sm:$0xff]  ;;  %v418_v28 = vld [vmem:[#allocation7 + $0xa8] sm:$0xff] }
  0x50   :  { %v406_v16 = vld [vmem:[#allocation5 + $0xe0] sm:$0xff]  ;;  %v419_v30 = vld [vmem:[#allocation7 + $0xb0] sm:$0xff]  ;;  %v420_v31 = vld [vmem:[#allocation7 + $0xb8] sm:$0xff] }
  0x51   :  { %1514 = vmatpush3.bf16.msra.mxu1 %v1513_v46  ;;  %v987_v46 = vld [vmem:[%s2085_s6] ss:$0 sm:$0xff]  ;;  %v422_v34 = vld [vmem:[#allocation7 + $0xc8] sm:$0xff] }
  0x52   :  { %1493 = vmatpush3.bf16.msra.mxu0 %v1492_v36  ;;  %1515 = vmatprep.subr.bf16.mxu1 %v1811_v0  ;;  %v381_v36 = vld [vmem:[#allocation2 + $0xc0] sm:$0xff]  ;;  %v672_v55 = vld [vmem:[#allocation2 + $0x108] sm:$0xff] }
  0x53   :  { %1494 = vmatprep.subr.bf16.mxu0 %v1811_v0  ;;  %v1558_v38 = vpack.c.bf16 %v382_v37, %v381_v36  ;;  %v413_v21 = vld [vmem:[#allocation7 + $0x80] sm:$0xff] }
  0x54   :  { %v1594_v24 = vpack.c.bf16 %v414_v22, %v413_v21  ;;  %v421_v33 = vld [vmem:[#allocation7 + $0xc0] sm:$0xff] }
  0x55   :  { %1517 = vmatpush3.bf16.msra.mxu1 %v1516_v49  ;;  %v993_v36 = vld [vmem:[%s2082_s3 + $0x1] ss:$0 sm:$0xff] }
  0x56   :  { %1496 = vmatpush3.bf16.msra.mxu0 %v1495_v39  ;;  %1518 = vmatprep.subr.bf16.mxu1 %v1811_v0  ;;  %v383_v39 = vld [vmem:[#allocation2 + $0xd0] sm:$0xff]  ;;  %v671_v54 = vld [vmem:[#allocation2 + $0x100] sm:$0xff] }
  0x57   :  { %1521 = vmatprep.subr.bf16.mxu0 %v1811_v0  ;;  %v1561_v42 = vpack.c.bf16 %v384_v41, %v383_v39  ;;  %v692_v22 = vld [vmem:[#allocation5 + $0x100] sm:$0xff] }
  0x59   :  { %1191 = vmatmul.mubr.f32.vlgmr.msra.gmra.mrb[0].mxu0 %v1941_v40  ;;  %1520 = vmatpush3.bf16.msra.mxu1 %v1519_v52  ;;  %v388_v52 = vld [vmem:[#allocation2 + $0xf8] sm:$0xff] }
  0x5a   :  { %1260 = vmatprep.mubr.msk.f32.mxu0 %vm1812_vm0, %v1813_v1  ;;  %1545 = vmatprep.subr.bf16.mxu1 %v1811_v0  ;;  %v1567_v53 = vpack.c.bf16 %v388_v52, %v387_v51  ;;  %v427_v51 = vld [vmem:[#allocation7 + $0xf0] sm:$0xff]  ;;  %v428_v52 = vld [vmem:[#allocation7 + $0xf8] sm:$0xff] }
  0x5b   :  { %1523 = vmatpush3.bf16.msra.mxu0 %v1522_v56  ;;  %v396_v56 = vld [vmem:[#allocation5 + $0x90] sm:$0xff] }
  0x5c   :  { %1524 = vmatprep.subr.bf16.mxu0 %v1811_v0 }
  0x5f   :  { %1526 = vmatpush3.bf16.msra.mxu0 %v1525_v58  ;;  %v397_v58 = vld [vmem:[#allocation5 + $0x98] sm:$0xff] }
  0x60   :  { %1527 = vmatprep.subr.bf16.mxu0 %v1811_v0  ;;  %v1573_v59 = vpack.c.bf16 %v397_v58, %v396_v56  ;;  %v673_v56 = vld [vmem:[#allocation2 + $0x110] sm:$0xff]  ;;  %v674_v58 = vld [vmem:[#allocation2 + $0x118] sm:$0xff] }
  0x63   :  { %1529 = vmatpush3.bf16.msra.mxu0 %v1528_v61  ;;  %v399_v61 = vld [vmem:[#allocation5 + $0xa8] sm:$0xff] }
  0x64   :  { %1530 = vmatprep.subr.bf16.mxu0 %v1811_v0  ;;  %v1576_v62 = vpack.c.bf16 %v399_v61, %v398_v60  ;;  %v675_v60 = vld [vmem:[#allocation2 + $0x120] sm:$0xff]  ;;  %v676_v61 = vld [vmem:[#allocation2 + $0x128] sm:$0xff] }
  0x67   :  { %1532 = vmatpush3.bf16.msra.mxu0 %v1531_v2  ;;  %v401_v2 = vld [vmem:[#allocation5 + $0xb8] sm:$0xff] }
  0x68   :  { %1533 = vmatprep.subr.bf16.mxu0 %v1811_v0  ;;  %v1579_v3 = vpack.c.bf16 %v401_v2, %v400_v63  ;;  %v677_v63 = vld [vmem:[#allocation2 + $0x130] sm:$0xff]  ;;  %v678_v2 = vld [vmem:[#allocation2 + $0x138] sm:$0xff] }
  0x6b   :  { %1535 = vmatpush3.bf16.msra.mxu0 %v1534_v5 }
  0x6c   :  { %1536 = vmatprep.subr.bf16.mxu0 %v1811_v0 }
  0x6f   :  { %1538 = vmatpush3.bf16.msra.mxu0 %v1537_v17  ;;  %v407_v17 = vld [vmem:[#allocation5 + $0xe8] sm:$0xff] }
  0x70   :  { %1539 = vmatprep.subr.bf16.mxu0 %v1811_v0 }
  0x73   :  { %1541 = vmatpush3.bf16.msra.mxu0 %v1540_v20  ;;  %v1591_v20 = vpack.c.bf16 %v409_v19, %v408_v18  ;;  %v685_v19 = vld [vmem:[#allocation2 + $0x170] sm:$0xff] }
  0x74   :  { %1542 = vmatprep.subr.bf16.mxu0 %v1811_v0 }
  0x77   :  { %1544 = vmatpush3.bf16.msra.mxu0 %v1543_v23  ;;  %v415_v23 = vld [vmem:[#allocation7 + $0x90] sm:$0xff] }
  0x78   :  { %1569 = vmatprep.subr.bf16.mxu0 %v1811_v0  ;;  %v1597_v26 = vpack.c.bf16 %v416_v25, %v415_v23  ;;  %v693_v23 = vld [vmem:[#allocation5 + $0x108] sm:$0xff] }
  0x79   :  { %v1642_v25 = vpack.c.bf16 %v693_v23, %v692_v22 }
  0xb9   :  { %v1959_v7 = vpop.permute.xlu0 %130 }
  0xba   :  { %v139_v8 = vmul.f32 %v985_v6, %v1959_v7  ;;  %v437_v37 = vmul.f32 %v993_v36, %v1959_v7 }
 0x12c   :  { %v206_v10 = vpop.f32.mrb[0].mxu0 }
 0x12d   :  { %v207_v11 = vadd.f32 %v206_v10, %v139_v8  ;;  %v1192_v12 = vpop.f32.mrb[1].mxu0  ;;  %v402_v10 = vld [vmem:[#allocation5 + $0xc0] sm:$0xff] }
 0x12f   :  { %v216_v13 = vadd.f32 %v986_v9, %v207_v11  ;;  %v403_v11 = vld [vmem:[#allocation5 + $0xc8] sm:$0xff] }
 0x130   :  { %v1582_v12 = vpack.c.bf16 %v403_v11, %v402_v10  ;;  %v682_v10 = vld [vmem:[#allocation2 + $0x158] sm:$0xff] }
 0x131   :  { %1700 = vtanh.f32 %v216_v13  ;;  %v404_v13 = vld [vmem:[#allocation5 + $0xd0] sm:$0xff] }
 0x13b   :  { %v1701_v14 = vpop.eup %1700 }
 0x13c   :  { %1226 = vmatmul.mubr.f32.vlgmr.msra.gmra.mrb[0].mxu1 %v1701_v14  ;;  %v405_v14 = vld [vmem:[#allocation5 + $0xd8] sm:$0xff] }
 0x13d   :  { %1295 = vmatprep.mubr.msk.f32.mxu1 %vm1812_vm0, %v1813_v1  ;;  %1547 = vmatpush3.bf16.msra.mxu1 %v1546_v27  ;;  %v1585_v15 = vpack.c.bf16 %v405_v14, %v404_v13  ;;  %v417_v27 = vld [vmem:[#allocation7 + $0xa0] sm:$0xff]  ;;  %v684_v13 = vld [vmem:[#allocation2 + $0x168] sm:$0xff] }
 0x13e   :  { %1548 = vmatprep.subr.bf16.mxu1 %v1811_v0 }
 0x141   :  { %1550 = vmatpush3.bf16.msra.mxu1 %v1549_v29  ;;  %v1600_v29 = vpack.c.bf16 %v418_v28, %v417_v27  ;;  %v696_v28 = vld [vmem:[#allocation5 + $0x120] sm:$0xff] }
 0x142   :  { %1551 = vmatprep.subr.bf16.mxu1 %v1811_v0 }
 0x145   :  { %1553 = vmatpush3.bf16.msra.mxu1 %v1552_v32  ;;  %v1603_v32 = vpack.c.bf16 %v420_v31, %v419_v30  ;;  %v698_v31 = vld [vmem:[#allocation5 + $0x130] sm:$0xff] }
 0x146   :  { %1554 = vmatprep.subr.bf16.mxu1 %v1811_v0 }
 0x149   :  { %1556 = vmatpush3.bf16.msra.mxu1 %v1555_v35  ;;  %v1606_v35 = vpack.c.bf16 %v422_v34, %v421_v33  ;;  %v996_v34 = vld [vmem:[%s2087_s8 + $0x1] ss:$0 sm:$0xff] }
 0x14a   :  { %1557 = vmatprep.subr.bf16.mxu1 %v1811_v0 }
 0x14d   :  { %1559 = vmatpush3.bf16.msra.mxu1 %v1558_v38  ;;  %v994_v38 = vld [vmem:[%s2083_s4 + $0x1] ss:$0 sm:$0xff] }
 0x14e   :  { %1560 = vmatprep.subr.bf16.mxu1 %v1811_v0 }
 0x151   :  { %1562 = vmatpush3.bf16.msra.mxu1 %v1561_v42 }
 0x152   :  { %1563 = vmatprep.subr.bf16.mxu1 %v1811_v0 }
 0x155   :  { %1565 = vmatpush3.bf16.msra.mxu1 %v1564_v45  ;;  %v423_v45 = vld [vmem:[#allocation7 + $0xd0] sm:$0xff] }
 0x156   :  { %1566 = vmatprep.subr.bf16.mxu1 %v1811_v0 }
 0x159   :  { %1568 = vmatpush3.bf16.msra.mxu1 %v1567_v53  ;;  %v1615_v53 = vpack.c.bf16 %v428_v52, %v427_v51  ;;  %v712_v51 = vld [vmem:[#allocation7 + $0x108] sm:$0xff]  ;;  %v713_v52 = vld [vmem:[#allocation7 + $0x110] sm:$0xff] }
 0x15a   :  { %1593 = vmatprep.subr.bf16.mxu1 %v1811_v0 }
 0x20f   :  { %v290_v47 = vpop.f32.mrb[0].mxu1 }
 0x210   :  { %v291_v48 = vadd.f32 %v987_v46, %v290_v47  ;;  %v1227_v49 = vpop.f32.mrb[1].mxu1  ;;  %v424_v46 = vld [vmem:[#allocation7 + $0xd8] sm:$0xff] }
 0x211   :  { %v1609_v47 = vpack.c.bf16 %v424_v46, %v423_v45  ;;  %v426_v49 = vld [vmem:[#allocation7 + $0xe8] sm:$0xff]  ;;  %v704_v46 = vld [vmem:[#allocation5 + $0x160] sm:$0xff] }
 0x212   :  { %1702 = vtanh.f32 %v291_v48  ;;  %v425_v48 = vld [vmem:[#allocation7 + $0xe0] sm:$0xff] }
 0x21c   :  { %v1703_v50 = vpop.eup %1702 }
 0x21d   :  { %1261 = vmatmul.mubr.f32.vlgmr.msra.gmra.mrb[2].mxu0 %v1703_v50  ;;  %v1612_v50 = vpack.c.bf16 %v426_v49, %v425_v48  ;;  %v706_v48 = vld [vmem:[#allocation5 + $0x170] sm:$0xff]  ;;  %v707_v49 = vld [vmem:[#allocation5 + $0x178] sm:$0xff] }
 0x21e   :  { %1330 = vmatprep.mubr.msk.f32.mxu0 %vm1812_vm0, %v1813_v1  ;;  %1571 = vmatpush3.bf16.msra.mxu0 %v1570_v57  ;;  %v1618_v57 = vpack.c.bf16 %v672_v55, %v671_v54  ;;  %v714_v54 = vld [vmem:[#allocation7 + $0x118] sm:$0xff] }
 0x21f   :  { %1572 = vmatprep.subr.bf16.mxu0 %v1811_v0  ;;  %v1669_v55 = vpack.c.bf16 %v714_v54, %v713_v52 }
 0x222   :  { %1574 = vmatpush3.bf16.msra.mxu0 %v1573_v59  ;;  %v1621_v59 = vpack.c.bf16 %v674_v58, %v673_v56  ;;  %v715_v56 = vld [vmem:[#allocation7 + $0x120] sm:$0xff] }
 0x223   :  { %1575 = vmatprep.subr.bf16.mxu0 %v1811_v0 }
 0x226   :  { %1577 = vmatpush3.bf16.msra.mxu0 %v1576_v62  ;;  %v1624_v62 = vpack.c.bf16 %v676_v61, %v675_v60  ;;  %v718_v60 = vld [vmem:[#allocation7 + $0x138] sm:$0xff] }
 0x227   :  { %1578 = vmatprep.subr.bf16.mxu0 %v1811_v0 }
 0x22a   :  { %1580 = vmatpush3.bf16.msra.mxu0 %v1579_v3  ;;  %v1627_v3 = vpack.c.bf16 %v678_v2, %v677_v63  ;;  %v720_v63 = vld [vmem:[#allocation7 + $0x148] sm:$0xff] }
 0x22b   :  { %1581 = vmatprep.subr.bf16.mxu0 %v1811_v0 }
 0x22e   :  { %1583 = vmatpush3.bf16.msra.mxu0 %v1582_v12  ;;  %v683_v12 = vld [vmem:[#allocation2 + $0x160] sm:$0xff] }
 0x22f   :  { %1584 = vmatprep.subr.bf16.mxu0 %v1811_v0  ;;  %v1636_v14 = vpack.c.bf16 %v684_v13, %v683_v12  ;;  %v721_v13 = vld [vmem:[#allocation7 + $0x150] sm:$0xff] }
 0x232   :  { %1586 = vmatpush3.bf16.msra.mxu0 %v1585_v15  ;;  %v995_v15 = vld [vmem:[%s2085_s6 + $0x1] ss:$0 sm:$0xff] }
 0x233   :  { %1587 = vmatprep.subr.bf16.mxu0 %v1811_v0 }
 0x2f0   :  { %v367_v5 = vpop.f32.mrb[2].mxu0 }
 0x2f1   :  { %v368_v6 = vadd.f32 %v988_v4, %v367_v5  ;;  %v1262_v8 = vpop.f32.mrb[3].mxu0  ;;  %v679_v4 = vld [vmem:[#allocation2 + $0x140] sm:$0xff]  ;;  %v680_v5 = vld [vmem:[#allocation2 + $0x148] sm:$0xff] }
 0x2f2   :  { %v681_v8 = vld [vmem:[#allocation2 + $0x150] sm:$0xff] }
 0x2f3   :  { %v1991_v9 = vadd.f32 %v368_v6, %v1941_v40  ;;  %v1588_v40 = vpack.c.bf16 %v407_v17, %v406_v16  ;;  %v1630_v6 = vpack.c.bf16 %v680_v5, %v679_v4  ;;  %v1633_v11 = vpack.c.bf16 %v682_v10, %v681_v8  ;;  %v1002_v5 = vld [vmem:[%s2083_s4 + $0x2] ss:$0 sm:$0xff] }
 0x2f5   :  { %1296 = vmatmul.mubr.f32.vlgmr.msra.gmra.mrb[2].mxu1 %v1991_v9  ;;  %1589 = vmatpush3.bf16.msra.mxu0 %v1588_v40 }
 0x2f6   :  { %1365 = vmatprep.mubr.msk.f32.mxu1 %vm1812_vm0, %v1813_v1  ;;  %1590 = vmatprep.subr.bf16.mxu0 %v1811_v0 }
 0x2f7   :  { %1595 = vmatpush3.bf16.msra.mxu1 %v1594_v24  ;;  %v694_v24 = vld [vmem:[#allocation5 + $0x110] sm:$0xff] }
 0x2f8   :  { %1596 = vmatprep.subr.bf16.mxu1 %v1811_v0 }
 0x2f9   :  { %1592 = vmatpush3.bf16.msra.mxu0 %v1591_v20  ;;  %v686_v20 = vld [vmem:[#allocation2 + $0x178] sm:$0xff] }
 0x2fa   :  { %1617 = vmatprep.subr.bf16.mxu0 %v1811_v0  ;;  %v1639_v21 = vpack.c.bf16 %v686_v20, %v685_v19  ;;  %v1003_v20 = vld [vmem:[%s2085_s6 + $0x2] ss:$0 sm:$0xff]  ;;  %s1778_s6 = scalar_lea.vmem %s976_s21, 128 }
 0x2fb   :  { %1598 = vmatpush3.bf16.msra.mxu1 %v1597_v26  ;;  %v695_v26 = vld [vmem:[#allocation5 + $0x118] sm:$0xff]  ;;  %p1779_p10 = scmp.ne.s32.totalorder %s976_s21, %s1778_s6  ;;  %p1784_p12 = scmp.lt.s32.totalorder %s1778_s6, %s1778_s6 }
 0x2fc   :  { %1599 = vmatprep.subr.bf16.mxu1 %v1811_v0  ;;  %v1645_v27 = vpack.c.bf16 %v695_v26, %v694_v24 }
 0x2fd   :  { %p1785_p13 = por %p1784_p12, %p1783_p11 }
 0x2ff   :  { %1601 = vmatpush3.bf16.msra.mxu1 %v1600_v29  ;;  %v697_v29 = vld [vmem:[#allocation5 + $0x128] sm:$0xff]  ;;  %p1786_p0 = pnand %p1785_p13, %p1779_p10 }
 0x300   :  { %1602 = vmatprep.subr.bf16.mxu1 %v1811_v0  ;;  %v1648_v30 = vpack.c.bf16 %v697_v29, %v696_v28 }
 0x303   :  { %1604 = vmatpush3.bf16.msra.mxu1 %v1603_v32  ;;  %v699_v32 = vld [vmem:[#allocation5 + $0x138] sm:$0xff] }
 0x304   :  { %1605 = vmatprep.subr.bf16.mxu1 %v1811_v0  ;;  %v1651_v33 = vpack.c.bf16 %v699_v32, %v698_v31 }
 0x307   :  { %1607 = vmatpush3.bf16.msra.mxu1 %v1606_v35 }
 0x308   :  { %1608 = vmatprep.subr.bf16.mxu1 %v1811_v0 }
 0x30b   :  { %1610 = vmatpush3.bf16.msra.mxu1 %v1609_v47  ;;  %v705_v47 = vld [vmem:[#allocation5 + $0x168] sm:$0xff] }
 0x30c   :  { %1611 = vmatprep.subr.bf16.mxu1 %v1811_v0 }
 0x30f   :  { %1613 = vmatpush3.bf16.msra.mxu1 %v1612_v50  ;;  %v1663_v50 = vpack.c.bf16 %v707_v49, %v706_v48 }
 0x310   :  { %1614 = vmatprep.subr.bf16.mxu1 %v1811_v0 }
 0x313   :  { %1616 = vmatpush3.bf16.msra.mxu1 %v1615_v53 }
 0x314   :  { %1641 = vmatprep.subr.bf16.mxu1 %v1811_v0 }
 0x3c8   :  { %v504_v39 = vpop.f32.mrb[2].mxu1 }
 0x3c9   :  { %v505_v41 = vadd.f32 %v504_v39, %v437_v37  ;;  %v1297_v42 = vpop.f32.mrb[3].mxu1  ;;  %v700_v39 = vld [vmem:[#allocation5 + $0x140] sm:$0xff] }
 0x3cb   :  { %v514_v43 = vadd.f32 %v994_v38, %v505_v41  ;;  %v701_v41 = vld [vmem:[#allocation5 + $0x148] sm:$0xff] }
 0x3cc   :  { %v1654_v42 = vpack.c.bf16 %v701_v41, %v700_v39 }
 0x3cd   :  { %1704 = vtanh.f32 %v514_v43  ;;  %v702_v43 = vld [vmem:[#allocation5 + $0x150] sm:$0xff] }
 0x3d7   :  { %v1705_v44 = vpop.eup %1704 }
 0x3d8   :  { %1331 = vmatmul.mubr.f32.vlgmr.msra.gmra.mrb[4].mxu0 %v1705_v44  ;;  %v703_v44 = vld [vmem:[#allocation5 + $0x158] sm:$0xff] }
 0x3d9   :  { %1400 = vmatprep.mubr.msk.f32.mxu0 %vm1812_vm0, %v1813_v1  ;;  %1619 = vmatpush3.bf16.msra.mxu0 %v1618_v57  ;;  %v1657_v45 = vpack.c.bf16 %v703_v44, %v702_v43  ;;  %v716_v57 = vld [vmem:[#allocation7 + $0x128] sm:$0xff] }
 0x3da   :  { %1620 = vmatprep.subr.bf16.mxu0 %v1811_v0  ;;  %v1672_v58 = vpack.c.bf16 %v716_v57, %v715_v56 }
 0x3dd   :  { %1622 = vmatpush3.bf16.msra.mxu0 %v1621_v59  ;;  %v717_v59 = vld [vmem:[#allocation7 + $0x130] sm:$0xff] }
 0x3de   :  { %1623 = vmatprep.subr.bf16.mxu0 %v1811_v0  ;;  %v1675_v61 = vpack.c.bf16 %v718_v60, %v717_v59 }
 0x3e1   :  { %1625 = vmatpush3.bf16.msra.mxu0 %v1624_v62  ;;  %v719_v62 = vld [vmem:[#allocation7 + $0x140] sm:$0xff] }
 0x3e2   :  { %1626 = vmatprep.subr.bf16.mxu0 %v1811_v0  ;;  %v1678_v2 = vpack.c.bf16 %v720_v63, %v719_v62 }
 0x3e5   :  { %1628 = vmatpush3.bf16.msra.mxu0 %v1627_v3  ;;  %v1001_v3 = vld [vmem:[%s2082_s3 + $0x2] ss:$0 sm:$0xff] }
 0x3e6   :  { %1629 = vmatprep.subr.bf16.mxu0 %v1811_v0  ;;  %v735_v4 = vmul.f32 %v1001_v3, %v1959_v7 }
 0x3e9   :  { %1631 = vmatpush3.bf16.msra.mxu0 %v1630_v6 }
 0x3ea   :  { %1632 = vmatprep.subr.bf16.mxu0 %v1811_v0 }
 0x3ed   :  { %1634 = vmatpush3.bf16.msra.mxu0 %v1633_v11 }
 0x3ee   :  { %1635 = vmatprep.subr.bf16.mxu0 %v1811_v0 }
 0x3f1   :  { %1637 = vmatpush3.bf16.msra.mxu0 %v1636_v14  ;;  %v722_v14 = vld [vmem:[#allocation7 + $0x158] sm:$0xff] }
 0x3f2   :  { %1638 = vmatprep.subr.bf16.mxu0 %v1811_v0 }
 0x3f5   :  { %1640 = vmatpush3.bf16.msra.mxu0 %v1639_v21 }
 0x3f6   :  { %1665 = vmatprep.subr.bf16.mxu0 %v1811_v0 }
 0x4ab   :  { %v588_v16 = vpop.f32.mrb[4].mxu0 }
 0x4ac   :  { %v589_v17 = vadd.f32 %v995_v15, %v588_v16  ;;  %v1332_v40 = vpop.f32.mrb[5].mxu0  ;;  %v1681_v15 = vpack.c.bf16 %v722_v14, %v721_v13  ;;  %v723_v16 = vld [vmem:[#allocation7 + $0x160] sm:$0xff] }
 0x4ad   :  { %v725_v40 = vld [vmem:[#allocation7 + $0x170] sm:$0xff] }
 0x4ae   :  { %1706 = vtanh.f32 %v589_v17  ;;  %v724_v17 = vld [vmem:[#allocation7 + $0x168] sm:$0xff] }
 0x4af   :  { %v1684_v7 = vpack.c.bf16 %v724_v17, %v723_v16 }
 0x4b8   :  { %v1707_v18 = vpop.eup %1706 }
 0x4b9   :  { %1366 = vmatmul.mubr.f32.vlgmr.msra.gmra.mrb[4].mxu1 %v1707_v18  ;;  %v726_v18 = vld [vmem:[#allocation7 + $0x178] sm:$0xff] }
 0x4ba   :  { %1435 = vmatprep.mubr.msk.f32.mxu1 %vm1812_vm0, %v1813_v1  ;;  %1643 = vmatpush3.bf16.msra.mxu1 %v1642_v25  ;;  %v1687_v19 = vpack.c.bf16 %v726_v18, %v725_v40  ;;  %v1004_v25 = vld [vmem:[%s2087_s8 + $0x2] ss:$0 sm:$0xff] }
 0x4bb   :  { %1644 = vmatprep.subr.bf16.mxu1 %v1811_v0 }
 0x4be   :  { %1646 = vmatpush3.bf16.msra.mxu1 %v1645_v27 }
 0x4bf   :  { %1647 = vmatprep.subr.bf16.mxu1 %v1811_v0 }
 0x4c2   :  { %1649 = vmatpush3.bf16.msra.mxu1 %v1648_v30 }
 0x4c3   :  { %1650 = vmatprep.subr.bf16.mxu1 %v1811_v0 }
 0x4c6   :  { %1652 = vmatpush3.bf16.msra.mxu1 %v1651_v33 }
 0x4c7   :  { %1653 = vmatprep.subr.bf16.mxu1 %v1811_v0 }
 0x4ca   :  { %1655 = vmatpush3.bf16.msra.mxu1 %v1654_v42 }
 0x4cb   :  { %1656 = vmatprep.subr.bf16.mxu1 %v1811_v0 }
 0x4ce   :  { %1658 = vmatpush3.bf16.msra.mxu1 %v1657_v45 }
 0x4cf   :  { %1659 = vmatprep.subr.bf16.mxu1 %v1811_v0 }
 0x58c   :  { %v665_v35 = vpop.f32.mrb[4].mxu1 }
 0x58d   :  { %v666_v36 = vadd.f32 %v996_v34, %v665_v35  ;;  %v1367_v37 = vpop.f32.mrb[5].mxu1 }
 0x58f   :  { %v2038_v38 = vadd.f32 %v666_v36, %v1991_v9  ;;  %v1660_v9 = vpack.c.bf16 %v705_v47, %v704_v46 }
 0x591   :  { %1401 = vmatmul.mubr.f32.vlgmr.msra.gmra.mrb[6].mxu0 %v2038_v38  ;;  %1661 = vmatpush3.bf16.msra.mxu1 %v1660_v9 }
 0x592   :  { %1470 = vmatprep.mubr.msk.f32.mxu0 %vm1812_vm0, %v1813_v1  ;;  %1662 = vmatprep.subr.bf16.mxu1 %v1811_v0  ;;  %v711_v1 = vld [vmem:[#allocation7 + $0x100] sm:$0xff] }
 0x593   :  { %v1666_v53 = vpack.c.bf16 %v712_v51, %v711_v1 }
 0x595   :  { %1664 = vmatpush3.bf16.msra.mxu1 %v1663_v50  ;;  %1667 = vmatpush3.bf16.msra.mxu0 %v1666_v53 }
 0x596   :  { %1668 = vmatprep.subr.bf16.mxu0 %v1811_v0 }
 0x599   :  { %1670 = vmatpush3.bf16.msra.mxu0 %v1669_v55 }
 0x59a   :  { %1671 = vmatprep.subr.bf16.mxu0 %v1811_v0 }
 0x59d   :  { %1673 = vmatpush3.bf16.msra.mxu0 %v1672_v58 }
 0x59e   :  { %1674 = vmatprep.subr.bf16.mxu0 %v1811_v0 }
 0x5a1   :  { %1676 = vmatpush3.bf16.msra.mxu0 %v1675_v61 }
 0x5a2   :  { %1677 = vmatprep.subr.bf16.mxu0 %v1811_v0 }
 0x5a5   :  { %1679 = vmatpush3.bf16.msra.mxu0 %v1678_v2 }
 0x5a6   :  { %1680 = vmatprep.subr.bf16.mxu0 %v1811_v0 }
 0x5a9   :  { %1682 = vmatpush3.bf16.msra.mxu0 %v1681_v15 }
 0x5aa   :  { %1683 = vmatprep.subr.bf16.mxu0 %v1811_v0 }
 0x5ad   :  { %1685 = vmatpush3.bf16.msra.mxu0 %v1684_v7 }
 0x5ae   :  { %1686 = vmatprep.subr.bf16.mxu0 %v1811_v0 }
 0x5b1   :  { %1688 = vmatpush3.bf16.msra.mxu0 %v1687_v19 }
 0x664   :  { %v802_v6 = vpop.f32.mrb[6].mxu0 }
 0x665   :  { %v803_v8 = vadd.f32 %v802_v6, %v735_v4  ;;  %v1402_v10 = vpop.f32.mrb[7].mxu0 }
 0x667   :  { %v812_v11 = vadd.f32 %v1002_v5, %v803_v8 }
 0x669   :  { %1708 = vtanh.f32 %v812_v11 }
 0x673   :  { %v1709_v12 = vpop.eup %1708 }
 0x674   :  { %1436 = vmatmul.mubr.f32.vlgmr.msra.gmra.mrb[6].mxu1 %v1709_v12 }
 0x747   :  { %v886_v21 = vpop.f32.mrb[6].mxu1 }
 0x748   :  { %v887_v22 = vadd.f32 %v1003_v20, %v886_v21  ;;  %v1437_v23 = vpop.f32.mrb[7].mxu1 }
 0x74a   :  { %1710 = vtanh.f32 %v887_v22 }
 0x754   :  { %v1711_v24 = vpop.eup %1710 }
 0x755   :  { %1471 = vmatmul.mubr.f32.vlgmr.msra.gmra.mrb[8].mxu0 %v1711_v24 }
 0x828   :  { %v963_v26 = vpop.f32.mrb[8].mxu0 }
 0x829   :  { %v964_v27 = vadd.f32 %v1004_v25, %v963_v26  ;;  %v1472_v0 = vpop.f32.mrb[9].mxu0 }
 0x82b   :  { %v967_v28 = vadd.f32 %v964_v27, %v2038_v38 }
 0x82d   :  { %968 = vst [vmem:[#allocation8] sm:$0xff] %v967_v28 }
 0x82e   :  { %1789 = shalt.err (!%p1786_p0)
}
 0x82f   :  { %s1790_s8 = scalar_lea.hbm %s2088_s9, 128 }
 0x830   :  { %p1791_p1 = scmp.ne.s32.totalorder %s2088_s9, %s1790_s8  ;;  %p1794_p2 = scmp.lt.u32.totalorder %s1790_s8, %s2088_s9 }
 0x832   :  { %p1796_p3 = pnand %p1794_p2, %p1791_p1 }
 0x834   :  { %1799 = shalt.err (!%p1796_p3)
}
 0x835   :  { %978 = dma.vmem_to_hbm [thread:$0]  %s976_s21, 128, %s2088_s9, [#allocation4]  }
 0x836   :  { %1804 = dma.done.wait [#allocation4], 128  }
 0x837   :  { %1805 = vsyncadd [#allocation4], 4294967168 }
 0x838   :  { %982 = vsyncpa [#allocation3], 1 }
 0x839   :  { %983 = vsyncpa [#allocation6], 1 }
 0x83a   :  { %984 = vsyncpa [#allocation4], 1 }

</bundles_post_ra>
